<compile_context>
chip_gen: v5e
topology: v5e:2x2
jax: 0.10.0
libtpu: 0.0.40
codegen_flags: <defaults>
</compile_context>

<pallas_src>
import functools

import jax
import jax.numpy as jnp
from jax import lax
from jax.experimental import pallas as pl
from jax.experimental.pallas import tpu as pltpu

LANES = 128
MAX_ROW_TILE = 1024   # (1024, 128) f32 tile = 512 KiB per input buffer
NUM_SLICES = 2        # leading "parallel" grid axis (sharded across TCs on v7x)


def _cdiv(a, b):
    return -(-a // b)


def _round_up(a, b):
    return _cdiv(a, b) * b


def _mixed_loss_kernel(x_ref, t_ref, out_ref, *, gamma, n_valid, row_tile,
                       blocks_per_slice, needs_mask):
    """Accumulates per-slice partial sums into out_ref of shape (3, 8, 128).

    out_ref rows: 0 = focal_sum, 1 = intersection (sig*t), 2 = sig_sum + t_sum.
    """
    i = pl.program_id(0)   # slice (parallel axis)
    j = pl.program_id(1)   # block within slice (reduction / arbitrary axis)

    @pl.when(j == 0)
    def _():
        out_ref[...] = jnp.zeros_like(out_ref)

    x = x_ref[...]
    t = t_ref[...].astype(jnp.float32)

    # ---- shared transcendentals: e = exp(-|x|) feeds both BCE and sigmoid ----
    ax = jnp.abs(x)
    e = jnp.exp(-ax)
    inv = 1.0 / (1.0 + e)
    sig = jnp.where(x >= 0.0, inv, e * inv)                  # sigmoid(x)
    softplus_neg_x = jnp.maximum(-x, 0.0) + jnp.log1p(e)     # log(1 + exp(-x)), stable
    bce = x - x * t + softplus_neg_x

    # Focal modulation: exp(gamma * logsigmoid(z)) == sigmoid(z) ** gamma.
    z = -x * (2.0 * t - 1.0)
    ez = jnp.exp(-jnp.abs(z))
    invz = 1.0 / (1.0 + ez)
    pz = jnp.where(z >= 0.0, invz, ez * invz)                # sigmoid(z)
    g = float(gamma)
    if g == int(g) and 0 <= g <= 8:
        mod = pz ** int(g)                                   # integer power -> VPU multiplies
    else:
        log_pz = jnp.minimum(z, 0.0) - jnp.log1p(ez)         # logsigmoid(z), stable
        mod = jnp.exp(g * log_pz)
    focal = mod * bce

    # The three reduced streams.
    inter = sig * t
    denom = sig + t

    if needs_mask:
        # Global element index of every lane of this tile vs the logical size.
        # Masking AFTER the elementwise math is safe: select is elementwise, so
        # any garbage (padding / duplicated phantom-block data) in invalid
        # lanes becomes exactly 0.0 and cannot contaminate valid lanes.
        base = (i * blocks_per_slice + j) * (row_tile * LANES)
        rid = lax.broadcasted_iota(jnp.int32, (row_tile, LANES), 0)
        lid = lax.broadcasted_iota(jnp.int32, (row_tile, LANES), 1)
        valid = (base + rid * LANES + lid) < n_valid
        focal = jnp.where(valid, focal, 0.0)
        inter = jnp.where(valid, inter, 0.0)
        denom = jnp.where(valid, denom, 0.0)

    def fold(v):
        # (row_tile, 128) -> (8, 128) partial sum: tile-aligned reshape followed
        # by elementwise vreg adds (pure VPU, no per-step XLU tree reduction).
        return v.reshape(-1, 8, LANES).sum(axis=0)

    out_ref[0, :, :] += fold(focal)
    out_ref[1, :, :] += fold(inter)
    out_ref[2, :, :] += fold(denom)


def mixed_loss(logits, target, *, alpha=10.0, gamma=2.0):
    if logits.shape != target.shape:
        raise ValueError(
            "Target size ({}) must be the same as input size ({})".format(
                target.shape, logits.shape
            )
        )

    x = logits.astype(jnp.float32).reshape(-1)
    t = target.astype(jnp.float32).reshape(-1)
    n_valid = int(x.shape[0])

    # Minimal pad only when the flat size is not lane-aligned (<=127 elements);
    # all tile-level raggedness is handled in-kernel via the iota mask.
    n_pad = (-n_valid) % LANES
    if n_pad:
        x = jnp.pad(x, (0, n_pad))
        t = jnp.pad(t, (0, n_pad))

    rows = x.shape[0] // LANES
    x2 = x.reshape(rows, LANES)
    t2 = t.reshape(rows, LANES)

    row_tile = min(MAX_ROW_TILE, _round_up(rows, 8))
    num_blocks = _cdiv(rows, row_tile)
    num_slices = min(NUM_SLICES, num_blocks)
    bps = _cdiv(num_blocks, num_slices)          # blocks per slice
    last_block = num_blocks - 1
    # Mask only needed when padded / phantom elements exist at all.
    needs_mask = (num_slices * bps * row_tile * LANES) != n_valid

    def in_map(i, j):
        # Clamp phantom trailing blocks (when blocks don't divide evenly across
        # slices) onto the last real block; their contributions are masked out
        # in-kernel, so the duplicated DMA is harmless.
        return (jnp.minimum(i * bps + j, last_block), 0)

    tile_spec = pl.BlockSpec((row_tile, LANES), in_map)

    out = pl.pallas_call(
        functools.partial(
            _mixed_loss_kernel,
            gamma=float(gamma),
            n_valid=n_valid,
            row_tile=int(row_tile),
            blocks_per_slice=int(bps),
            needs_mask=bool(needs_mask),
        ),
        out_shape=jax.ShapeDtypeStruct((num_slices * 3, 8, LANES), jnp.float32),
        grid_spec=pltpu.PrefetchScalarGridSpec(
            num_scalar_prefetch=0,
            grid=(num_slices, bps),
            in_specs=[tile_spec, tile_spec],
            out_specs=pl.BlockSpec((3, 8, LANES), lambda i, j: (i, 0, 0)),
        ),
        compiler_params=pltpu.CompilerParams(
            dimension_semantics=("parallel", "arbitrary"),
        ),
    )(x2, t2)

    # Final cross-lane reduction + scalar combination (tiny; plain JAX glue).
    sums = out.reshape(num_slices, 3, 8 * LANES).sum(axis=(0, 2))
    focal_mean = sums[0] / jnp.float32(n_valid)
    smooth = 1.0
    dice = (2.0 * sums[1] + smooth) / (sums[2] + smooth)
    loss = alpha * focal_mean - jnp.log(dice)
    return loss  # scalar; .mean() of a scalar is a no-op


def _mixed_loss_ref(logits, target, *, alpha=10.0, gamma=2.0):
    """Pure-JAX reference mirroring the PyTorch code."""
    x = logits.astype(jnp.float32)
    t = target.astype(jnp.float32)
    max_val = jnp.maximum(-x, 0.0)
    bce = x - x * t + max_val + jnp.log(jnp.exp(-max_val) + jnp.exp(-x - max_val))
    invprobs = jax.nn.log_sigmoid(-x * (t * 2.0 - 1.0))
    focal = jnp.mean(jnp.exp(invprobs * gamma) * bce)
    sig = jax.nn.sigmoid(x).reshape(-1)
    tf = t.reshape(-1)
    dice = (2.0 * jnp.sum(sig * tf) + 1.0) / (jnp.sum(sig) + jnp.sum(tf) + 1.0)
    return alpha * focal - jnp.log(dice)


if __name__ == "__main__":
    key = jax.random.PRNGKey(0)
    k1, k2 = jax.random.split(key)
    # NCHW, small shapes
    B, C, H, W = 2, 4, 16, 16
    logits = jax.random.normal(k1, (B, C, H, W), dtype=jnp.float32)
    target = (jax.random.uniform(k2, (B, C, H, W)) > 0.5).astype(jnp.float32)

    alpha, gamma = 10.0, 2.0
    out = mixed_loss(logits, target, alpha=alpha, gamma=gamma)
    out = jax.block_until_ready(out)
    ref = _mixed_loss_ref(logits, target, alpha=alpha, gamma=gamma)
    assert jnp.allclose(out, ref, rtol=1e-5, atol=1e-5), (out, ref)

    # Second case: flat size not a multiple of 128 -> exercises the in-kernel
    # iota tail-mask path (partial / ragged block, block larger than the array).
    k3, k4 = jax.random.split(k1)
    logits2 = jax.random.normal(k3, (1, 1, 10, 10), dtype=jnp.float32)
    target2 = (jax.random.uniform(k4, (1, 1, 10, 10)) > 0.5).astype(jnp.float32)
    out2 = jax.block_until_ready(mixed_loss(logits2, target2, alpha=alpha, gamma=gamma))
    ref2 = _mixed_loss_ref(logits2, target2, alpha=alpha, gamma=gamma)
    assert jnp.allclose(out2, ref2, rtol=1e-5, atol=1e-5), (out2, ref2)

    # Third case: larger multi-tile input (multiple reduction steps per slice).
    k5, k6 = jax.random.split(k2)
    logits3 = jax.random.normal(k5, (2, 3, 96, 96), dtype=jnp.float32)
    target3 = (jax.random.uniform(k6, (2, 3, 96, 96)) > 0.5).astype(jnp.float32)
    out3 = jax.block_until_ready(mixed_loss(logits3, target3, alpha=alpha, gamma=gamma))
    ref3 = _mixed_loss_ref(logits3, target3, alpha=alpha, gamma=gamma)
    assert jnp.allclose(out3, ref3, rtol=1e-5, atol=1e-5), (out3, ref3)

    print("KERNEL_OK")
</pallas_src>

<mosaic_0001>
module attributes {stable_mosaic.version = 11 : i64} {
  func.func @_mixed_loss_kernel(%arg0: i32, %arg1: i32, %arg2: memref<16x128xf32, #tpu.memory_space<vmem>>, %arg3: memref<16x128xf32, #tpu.memory_space<vmem>>, %arg4: memref<3x8x128xf32, #tpu.memory_space<vmem>>) attributes {dimension_semantics = [#tpu.dimension_semantics<parallel>, #tpu.dimension_semantics<arbitrary>], iteration_bounds = array<i64: 1, 1>, scalar_prefetch = 0 : i64, scratch_operands = 0 : i64, tpu.core_type = #tpu.core_type<tc>, window_params = [{transform_indices = @transform_0, window_bounds = array<i64: 16, 128>}, {transform_indices = @transform_1, window_bounds = array<i64: 16, 128>}, {transform_indices = @transform_2, window_bounds = array<i64: 3, 8, 128>}]} {
    %c0_i32 = arith.constant 0 : i32
    %0 = arith.cmpi eq, %arg1, %c0_i32 : i32
    %1 = arith.extui %0 : i1 to i32
    %c0_i32_0 = arith.constant 0 : i32
    %2 = arith.cmpi ne, %1, %c0_i32_0 : i32
    scf.if %2 {
      %cst_35 = arith.constant 0.000000e+00 : f32
      %73 = vector.broadcast %cst_35 : f32 to vector<3x8x128xf32>
      %c0_36 = arith.constant 0 : index
      %c0_37 = arith.constant 0 : index
      %c0_38 = arith.constant 0 : index
      %74 = vector.load %arg4[%c0_36, %c0_37, %c0_38] : memref<3x8x128xf32, #tpu.memory_space<vmem>>, vector<3x8x128xf32>
      tpu.vector_store %arg4[%c0_36, %c0_37, %c0_38], %73 {strides = array<i32>} : memref<3x8x128xf32, #tpu.memory_space<vmem>>, vector<3x8x128xf32>,
    } else {
    }
    %c0 = arith.constant 0 : index
    %c0_1 = arith.constant 0 : index
    %3 = vector.load %arg2[%c0, %c0_1] : memref<16x128xf32, #tpu.memory_space<vmem>>, vector<16x128xf32>
    %c0_2 = arith.constant 0 : index
    %c0_3 = arith.constant 0 : index
    %4 = vector.load %arg3[%c0_2, %c0_3] : memref<16x128xf32, #tpu.memory_space<vmem>>, vector<16x128xf32>
    %5 = math.absf %3 : vector<16x128xf32>
    %cst = arith.constant 0.000000e+00 : f32
    %6 = vector.broadcast %cst : f32 to vector<16x128xf32>
    %7 = arith.subf %6, %5 : vector<16x128xf32>
    %8 = math.exp %7 : vector<16x128xf32>
    %cst_4 = arith.constant 1.000000e+00 : f32
    %9 = vector.broadcast %cst_4 : f32 to vector<16x128xf32>
    %10 = arith.addf %9, %8 : vector<16x128xf32>
    %cst_5 = arith.constant 1.000000e+00 : f32
    %11 = vector.broadcast %cst_5 : f32 to vector<16x128xf32>
    %12 = arith.divf %11, %10 : vector<16x128xf32>
    %cst_6 = arith.constant 0.000000e+00 : f32
    %13 = vector.broadcast %cst_6 : f32 to vector<16x128xf32>
    %14 = arith.cmpf oge, %3, %13 : vector<16x128xf32>
    %15 = arith.mulf %8, %12 : vector<16x128xf32>
    %16 = arith.select %14, %12, %15 : vector<16x128xi1>, vector<16x128xf32>
    %cst_7 = arith.constant 0.000000e+00 : f32
    %17 = vector.broadcast %cst_7 : f32 to vector<16x128xf32>
    %18 = arith.subf %17, %3 : vector<16x128xf32>
    %cst_8 = arith.constant 0.000000e+00 : f32
    %19 = vector.broadcast %cst_8 : f32 to vector<16x128xf32>
    %20 = arith.maximumf %18, %19 : vector<16x128xf32>
    %21 = math.log1p %8 : vector<16x128xf32>
    %22 = arith.addf %20, %21 : vector<16x128xf32>
    %23 = arith.mulf %3, %4 : vector<16x128xf32>
    %24 = arith.subf %3, %23 : vector<16x128xf32>
    %25 = arith.addf %24, %22 : vector<16x128xf32>
    %cst_9 = arith.constant 0.000000e+00 : f32
    %26 = vector.broadcast %cst_9 : f32 to vector<16x128xf32>
    %27 = arith.subf %26, %3 : vector<16x128xf32>
    %cst_10 = arith.constant 2.000000e+00 : f32
    %28 = vector.broadcast %cst_10 : f32 to vector<16x128xf32>
    %29 = arith.mulf %28, %4 : vector<16x128xf32>
    %cst_11 = arith.constant 1.000000e+00 : f32
    %30 = vector.broadcast %cst_11 : f32 to vector<16x128xf32>
    %31 = arith.subf %29, %30 : vector<16x128xf32>
    %32 = arith.mulf %27, %31 : vector<16x128xf32>
    %33 = math.absf %32 : vector<16x128xf32>
    %cst_12 = arith.constant 0.000000e+00 : f32
    %34 = vector.broadcast %cst_12 : f32 to vector<16x128xf32>
    %35 = arith.subf %34, %33 : vector<16x128xf32>
    %36 = math.exp %35 : vector<16x128xf32>
    %cst_13 = arith.constant 1.000000e+00 : f32
    %37 = vector.broadcast %cst_13 : f32 to vector<16x128xf32>
    %38 = arith.addf %37, %36 : vector<16x128xf32>
    %cst_14 = arith.constant 1.000000e+00 : f32
    %39 = vector.broadcast %cst_14 : f32 to vector<16x128xf32>
    %40 = arith.divf %39, %38 : vector<16x128xf32>
    %cst_15 = arith.constant 0.000000e+00 : f32
    %41 = vector.broadcast %cst_15 : f32 to vector<16x128xf32>
    %42 = arith.cmpf oge, %32, %41 : vector<16x128xf32>
    %43 = arith.mulf %36, %40 : vector<16x128xf32>
    %44 = arith.select %42, %40, %43 : vector<16x128xi1>, vector<16x128xf32>
    %45 = arith.mulf %44, %44 : vector<16x128xf32>
    %46 = arith.mulf %45, %25 : vector<16x128xf32>
    %47 = arith.mulf %16, %4 : vector<16x128xf32>
    %48 = arith.addf %16, %4 : vector<16x128xf32>
    %c0_16 = arith.constant 0 : index
    %c0_17 = arith.constant 0 : index
    %c0_18 = arith.constant 0 : index
    %49 = vector.load %arg4[%c0_16, %c0_17, %c0_18] : memref<3x8x128xf32, #tpu.memory_space<vmem>>, vector<1x8x128xf32>
    %50 = vector.shape_cast %49 : vector<1x8x128xf32> to vector<8x128xf32>
    %51 = vector.shape_cast %46 : vector<16x128xf32> to vector<2x8x128xf32>
    %cst_19 = arith.constant dense<0.000000e+00> : vector<8x128xf32>
    %52 = vector.multi_reduction <add>, %51, %cst_19 [0] : vector<2x8x128xf32> to vector<8x128xf32>
    %53 = arith.addf %50, %52 : vector<8x128xf32>
    %c0_20 = arith.constant 0 : index
    %c0_21 = arith.constant 0 : index
    %c0_22 = arith.constant 0 : index
    %54 = vector.load %arg4[%c0_20, %c0_21, %c0_22] : memref<3x8x128xf32, #tpu.memory_space<vmem>>, vector<1x8x128xf32>
    %55 = vector.shape_cast %54 : vector<1x8x128xf32> to vector<8x128xf32>
    %56 = vector.shape_cast %53 : vector<8x128xf32> to vector<1x8x128xf32>
    tpu.vector_store %arg4[%c0_20, %c0_21, %c0_22], %56 {strides = array<i32>} : memref<3x8x128xf32, #tpu.memory_space<vmem>>, vector<1x8x128xf32>,
    %c1 = arith.constant 1 : index
    %c0_23 = arith.constant 0 : index
    %c0_24 = arith.constant 0 : index
    %57 = vector.load %arg4[%c1, %c0_23, %c0_24] : memref<3x8x128xf32, #tpu.memory_space<vmem>>, vector<1x8x128xf32>
    %58 = vector.shape_cast %57 : vector<1x8x128xf32> to vector<8x128xf32>
    %59 = vector.shape_cast %47 : vector<16x128xf32> to vector<2x8x128xf32>
    %cst_25 = arith.constant dense<0.000000e+00> : vector<8x128xf32>
    %60 = vector.multi_reduction <add>, %59, %cst_25 [0] : vector<2x8x128xf32> to vector<8x128xf32>
    %61 = arith.addf %58, %60 : vector<8x128xf32>
    %c1_26 = arith.constant 1 : index
    %c0_27 = arith.constant 0 : index
    %c0_28 = arith.constant 0 : index
    %62 = vector.load %arg4[%c1_26, %c0_27, %c0_28] : memref<3x8x128xf32, #tpu.memory_space<vmem>>, vector<1x8x128xf32>
    %63 = vector.shape_cast %62 : vector<1x8x128xf32> to vector<8x128xf32>
    %64 = vector.shape_cast %61 : vector<8x128xf32> to vector<1x8x128xf32>
    tpu.vector_store %arg4[%c1_26, %c0_27, %c0_28], %64 {strides = array<i32>} : memref<3x8x128xf32, #tpu.memory_space<vmem>>, vector<1x8x128xf32>,
    %c2 = arith.constant 2 : index
    %c0_29 = arith.constant 0 : index
    %c0_30 = arith.constant 0 : index
    %65 = vector.load %arg4[%c2, %c0_29, %c0_30] : memref<3x8x128xf32, #tpu.memory_space<vmem>>, vector<1x8x128xf32>
    %66 = vector.shape_cast %65 : vector<1x8x128xf32> to vector<8x128xf32>
    %67 = vector.shape_cast %48 : vector<16x128xf32> to vector<2x8x128xf32>
    %cst_31 = arith.constant dense<0.000000e+00> : vector<8x128xf32>
    %68 = vector.multi_reduction <add>, %67, %cst_31 [0] : vector<2x8x128xf32> to vector<8x128xf32>
    %69 = arith.addf %66, %68 : vector<8x128xf32>
    %c2_32 = arith.constant 2 : index
    %c0_33 = arith.constant 0 : index
    %c0_34 = arith.constant 0 : index
    %70 = vector.load %arg4[%c2_32, %c0_33, %c0_34] : memref<3x8x128xf32, #tpu.memory_space<vmem>>, vector<1x8x128xf32>
    %71 = vector.shape_cast %70 : vector<1x8x128xf32> to vector<8x128xf32>
    %72 = vector.shape_cast %69 : vector<8x128xf32> to vector<1x8x128xf32>
    tpu.vector_store %arg4[%c2_32, %c0_33, %c0_34], %72 {strides = array<i32>} : memref<3x8x128xf32, #tpu.memory_space<vmem>>, vector<1x8x128xf32>,
    return
  }
  func.func @transform_0(%arg0: i32, %arg1: i32) -> (i32, i32) {
    %c1_i32 = arith.constant 1 : i32
    %0 = arith.muli %arg0, %c1_i32 : i32
    %1 = arith.addi %0, %arg1 : i32
    %c0_i32 = arith.constant 0 : i32
    %2 = arith.minsi %1, %c0_i32 : i32
    %c0_i32_0 = arith.constant 0 : i32
    %c0_i32_1 = arith.constant 0 : i32
    return %2, %c0_i32_0 : i32, i32
  }
  func.func @transform_1(%arg0: i32, %arg1: i32) -> (i32, i32) {
    %c1_i32 = arith.constant 1 : i32
    %0 = arith.muli %arg0, %c1_i32 : i32
    %1 = arith.addi %0, %arg1 : i32
    %c0_i32 = arith.constant 0 : i32
    %2 = arith.minsi %1, %c0_i32 : i32
    %c0_i32_0 = arith.constant 0 : i32
    %c0_i32_1 = arith.constant 0 : i32
    return %2, %c0_i32_0 : i32, i32
  }
  func.func @transform_2(%arg0: i32, %arg1: i32) -> (i32, i32, i32) {
    %c0_i32 = arith.constant 0 : i32
    %c0_i32_0 = arith.constant 0 : i32
    %c0_i32_1 = arith.constant 0 : i32
    return %arg0, %c0_i32, %c0_i32_0 : i32, i32, i32
  }
}

</mosaic_0001>

<bundles_post_ra>
// kernel: tpu_custom_call.1
= control target key start
LH: loop header
LB: loop body
LE: loop exit
PB: predicated region body
PF: predicated region fallthrough
CT: control target
= control target key end

     0   :  { %7 = vsyncpa [#allocation3], 0  ;;  %s562_s0 = inlined_call_operand.hbm [shape: f32[16,128], index: 0, kind: input, shape index: {}]   ;;  %s563_s1 = inlined_call_operand.hbm [shape: f32[16,128], index: 1, kind: input, shape index: {}]   ;;  %s564_s2 = inlined_call_operand.hbm [shape: f32[3,8,128], index: 2, kind: output, shape index: {}]  }
   0x1   :  { %8 = vsyncpa [#allocation6], 0 }
   0x2   :  { %9 = vsyncpa [#allocation4], 0  ;;  %s20_s11 = sshll.u32 %s562_s0, 4  ;;  %s355_s12 = smov [#allocation2]   ;;  %s21_s11 = int_to_ptr.hbm [resolvable:$true] %s20_s11 }
   0x3   :  { %s22_s13 = sshll.u32 %s355_s12, 4  ;;  %s39_s16 = sshll.u32 %s563_s1, 4  ;;  %s23_s13 = int_to_ptr.vmem [resolvable:$true] %s22_s13  ;;  %s40_s16 = int_to_ptr.hbm [resolvable:$true] %s39_s16 }
   0x4   :  { %s356_s17 = smov 128   ;;  %s357_s18 = smov 8  }
   0x5   :  { %28 = dma.hbm_to_vmem [thread:$0]  %s21_s11, 256, %s23_s13, [#allocation3], %s356_s17, %s356_s17, %s357_s18  }
   0x6   :  { %s358_s19 = smov [#allocation5]  }
   0x7   :  { %s41_s20 = sshll.u32 %s358_s19, 4  ;;  %s42_s20 = int_to_ptr.vmem [resolvable:$true] %s41_s20 }
   0x8   :  { %47 = dma.hbm_to_vmem [thread:$0]  %s40_s16, 256, %s42_s20, [#allocation6], %s356_s17, %s356_s17, %s357_s18  }
   0x9   :  { %349 = dma.done.wait [#allocation3], 256  }
   0xa   :  { %350 = vsyncadd [#allocation3], 4294967040 }
   0xb   :  { %351 = dma.done.wait [#allocation6], 256  }
   0xc   :  { %352 = vsyncadd [#allocation6], 4294967040  ;;  %v387_v0 = vld [vmem:[#allocation2] sm:$0xff]  ;;  %v389_v1 = vld [vmem:[#allocation2 + $0x8] sm:$0xff]  ;;  %s359_s0 = smov [#allocation7]   ;;  %s231_s23 = sshll.u32 %s564_s2, 4  ;;  %s232_s23 = int_to_ptr.hbm [resolvable:$true] %s231_s23 }
   0xd   :  { %v391_v2 = vld [vmem:[#allocation5] sm:$0xff]  ;;  %v393_v3 = vld [vmem:[#allocation5 + $0x8] sm:$0xff]  ;;  %v75_v4 = vand.u32 2147483647, %v387_v0  ;;  %v76_v5 = vand.u32 2147483647, %v389_v1 }
   0xe   :  { %v121_v6 = vsub.f32 0.0, %v387_v0  ;;  %v122_v7 = vsub.f32 0.0, %v389_v1  ;;  %v151_v8 = vmul.f32 2.0, %v391_v2  ;;  %v152_v9 = vmul.f32 2.0, %v393_v3  ;;  %s229_s1 = sshll.u32 %s359_s0, 4  ;;  %s230_s1 = int_to_ptr.vmem [resolvable:$true] %s229_s1 }
   0xf   :  { %v77_v10 = vsub.f32 0.0, %v75_v4  ;;  %v78_v11 = vsub.f32 0.0, %v76_v5  ;;  %v420_v30 = vmul.f32 %v391_v2, %v387_v0  ;;  %v428_v33 = vmul.f32 %v393_v3, %v389_v1 }
  0x10   :  { %v249_v12 = vadd.f32 -1.0, %v151_v8  ;;  %v250_v13 = vadd.f32 -1.0, %v152_v9  ;;  %v424_v32 = vmax.f32 %v121_v6, 0.0  ;;  %v441_v42 = vmax.f32 %v122_v7, 0.0 }
  0x11   :  { %v79_v14 = vmul.f32 1.442695, %v77_v10  ;;  %v81_v15 = vmul.f32 1.442695, %v78_v11  ;;  %v147_v43 = vsub.f32 %v387_v0, %v420_v30  ;;  %v148_v50 = vsub.f32 %v389_v1, %v428_v33 }
  0x12   :  { %v401_v16 = vmul.f32 %v249_v12, %v121_v6  ;;  %v403_v17 = vmul.f32 %v250_v13, %v122_v7  ;;  %vm115_vm4 = vcmp.ge.f32.partialorder %v387_v0, 0.0  ;;  %vm116_vm9 = vcmp.ge.f32.partialorder %v389_v1, 0.0 }
  0x13   :  { %257 = vpow2.f32 %v79_v14 }
  0x14   :  { %259 = vpow2.f32 %v81_v15  ;;  %v157_v18 = vand.u32 2147483647, %v401_v16  ;;  %v158_v19 = vand.u32 2147483647, %v403_v17 }
  0x16   :  { %v159_v20 = vsub.f32 0.0, %v157_v18  ;;  %v160_v21 = vsub.f32 0.0, %v158_v19 }
  0x18   :  { %v161_v22 = vmul.f32 1.442695, %v159_v20  ;;  %v163_v23 = vmul.f32 1.442695, %v160_v21 }
  0x19   :  { %v407_v24 = vpop.eup %257 }
  0x1a   :  { %v409_v25 = vpop.eup %259  ;;  %v83_v26 = vadd.f32 1.0, %v407_v24  ;;  %261 = vpow2.f32 %v161_v22  ;;  %v128_v28 = vmul.f32 -0.5, %v407_v24  ;;  %v131_v35 = vand.u32 2147483647, %v407_v24 }
  0x1b   :  { %v413_v27 = vadd.f32 1.0, %v409_v25  ;;  %263 = vpow2.f32 %v163_v23  ;;  %v137_v29 = vmul.f32 -0.5, %v409_v25  ;;  %v140_v36 = vand.u32 2147483647, %v409_v25 }
  0x1c   :  { %265 = vrcp.f32 %v83_v26  ;;  %v129_v39 = vadd.f32 1.0, %v128_v28  ;;  %v94_v44 = vand.u32 2147483647, %v83_v26  ;;  %v96_v46 = vand.u32 2147483648, %v83_v26 }
  0x1d   :  { %267 = vrcp.f32 %v413_v27  ;;  %v138_v40 = vadd.f32 1.0, %v137_v29  ;;  %v109_v47 = vand.u32 2147483647, %v413_v27  ;;  %v111_v48 = vand.u32 2147483648, %v413_v27 }
  0x1e   :  { %269 = vlog2.f32 %v83_v26  ;;  %vm451_vm0 = vcmp.lt.f32.partialorder %v131_v35, 0.0004427343  ;;  %vm90_vm1 = vweird.f32 %v83_v26  ;;  %v130_v52 = vmul.f32 %v407_v24, %v129_v39 }
  0x1f   :  { %271 = vlog2.f32 %v413_v27  ;;  %v139_v53 = vmul.f32 %v409_v25, %v138_v40  ;;  %vm459_vm2 = vcmp.lt.f32.partialorder %v140_v36, 0.0004427343  ;;  %vm105_vm3 = vweird.f32 %v413_v27 }
  0x20   :  { %v422_v31 = vpop.eup %261  ;;  %vm465_vm6 = vcmp.eq.f32.partialorder %v94_v44, 8.507059e+37  ;;  %v97_v60 = vor.u32 1.1754944e-38, %v96_v46  ;;  %vm472_vm8 = vcmp.eq.f32.partialorder %v109_v47, 8.507059e+37  ;;  %v112_v62 = vor.u32 1.1754944e-38, %v111_v48 }
  0x21   :  { %v430_v34 = vpop.eup %263  ;;  %v435_v37 = vadd.f32 1.0, %v422_v31 }
  0x22   :  { %v266_v38 = vpop.eup %265  ;;  %v439_v41 = vadd.f32 1.0, %v430_v34 }
  0x23   :  { %273 = vrcp.f32 %v435_v37  ;;  %v446_v45 = vpop.eup %267  ;;  %v86_v51 = vmul.f32 %v266_v38, %v83_v26  ;;  %vm91_vm5 = vweird.f32 %v266_v38  ;;  %vm172_vm7 = vweird.f32 %v435_v37 }
  0x24   :  { %275 = vrcp.f32 %v439_v41  ;;  %v270_v55 = vpop.eup %269  ;;  %v101_v58 = vmul.f32 %v446_v45, %v413_v27  ;;  %v176_v4 = vand.u32 2147483647, %v435_v37  ;;  %v178_v5 = vand.u32 2147483648, %v435_v37  ;;  %vm483_vm11 = vmor %vm90_vm1, %vm91_vm5 }
  0x25   :  { %v87_v56 = vsub.f32 1.0, %v86_v51  ;;  %v272_v59 = vpop.eup %271  ;;  %v127_v9 = vmul.f32 0.6931472, %v270_v55  ;;  %vm187_vm10 = vweird.f32 %v439_v41  ;;  %vm106_vm12 = vweird.f32 %v446_v45 }
  0x26   :  { %v102_v7 = vsub.f32 1.0, %v101_v58  ;;  %v136_v12 = vmul.f32 0.6931472, %v272_v59  ;;  %v191_v14 = vand.u32 2147483647, %v439_v41  ;;  %v193_v19 = vand.u32 2147483648, %v439_v41  ;;  %vm500_vm1 = vmor %vm105_vm3, %vm106_vm12 }
  0x27   :  { %v88_v6 = vmul.f32 %v266_v38, %v87_v56  ;;  %vm492_vm14 = vcmp.eq.f32.partialorder %v176_v4, 8.507059e+37  ;;  %v133_v28 = vsel %vm451_vm0, %v130_v52, %v127_v9 }
  0x28   :  { %v103_v20 = vmul.f32 %v446_v45, %v102_v7  ;;  %v142_v39 = vsel %vm459_vm2, %v139_v53, %v136_v12  ;;  %vm192_vm3 = vcmp.eq.f32.partialorder %v191_v14, 8.507059e+37  ;;  %v194_v48 = vor.u32 1.1754944e-38, %v193_v19 }
  0x29   :  { %v274_v63 = vpop.eup %273  ;;  %v89_v15 = vadd.f32 %v266_v38, %v88_v6  ;;  %v143_v49 = vadd.f32 %v133_v28, %v424_v32  ;;  %vm197_vm2 = vcmp.ge.f32.partialorder %v401_v16, 0.0 }
  0x2a   :  { %v276_v8 = vpop.eup %275  ;;  %v168_v10 = vmul.f32 %v274_v63, %v435_v37  ;;  %vm173_vm13 = vweird.f32 %v274_v63  ;;  %v104_v36 = vadd.f32 %v446_v45, %v103_v20 }
  0x2b   :  { %v183_v13 = vmul.f32 %v276_v8, %v439_v41  ;;  %vm188_vm15 = vweird.f32 %v276_v8  ;;  %v93_v23 = vsel %vm483_vm11, %v266_v38, %v89_v15  ;;  %vm513_vm5 = vmor %vm172_vm7, %vm173_vm13  ;;  %v179_v38 = vor.u32 1.1754944e-38, %v178_v5 }
  0x2c   :  { %v169_v18 = vsub.f32 1.0, %v168_v10  ;;  %v98_v35 = vsel %vm465_vm6, %v97_v60, %v93_v23  ;;  %vm520_vm0 = vmor %vm187_vm10, %vm188_vm15  ;;  %v108_v37 = vsel %vm500_vm1, %v446_v45, %v104_v36  ;;  %v144_v41 = vadd.f32 %v142_v39, %v441_v42 }
  0x2d   :  { %v184_v22 = vsub.f32 1.0, %v183_v13  ;;  %v117_v44 = vmul.f32 %v407_v24, %v98_v35  ;;  %v113_v52 = vsel %vm472_vm8, %v112_v62, %v108_v37 }
  0x2e   :  { %v170_v29 = vmul.f32 %v274_v63, %v169_v18  ;;  %v118_v54 = vmul.f32 %v409_v25, %v113_v52  ;;  %v149_v25 = vadd.f32 %v147_v43, %v143_v49 }
  0x2f   :  { %v185_v40 = vmul.f32 %v276_v8, %v184_v22  ;;  %v119_v24 = vsel %vm115_vm4, %v98_v35, %v117_v44  ;;  %vm198_vm4 = vcmp.ge.f32.partialorder %v403_v17, 0.0 }
  0x30   :  { %v171_v46 = vadd.f32 %v274_v63, %v170_v29  ;;  %v207_v55 = vmul.f32 %v119_v24, %v391_v2  ;;  %v209_v56 = vadd.f32 %v119_v24, %v391_v2  ;;  %v120_v16 = vsel %vm116_vm9, %v113_v52, %v118_v54 }
  0x31   :  { %v186_v51 = vadd.f32 %v276_v8, %v185_v40  ;;  %v208_v59 = vmul.f32 %v120_v16, %v393_v3  ;;  %v210_v60 = vadd.f32 %v120_v16, %v393_v3  ;;  %v150_v2 = vadd.f32 %v148_v50, %v144_v41 }
  0x32   :  { %v175_v53 = vsel %vm513_vm5, %v274_v63, %v171_v46 }
  0x33   :  { %v180_v45 = vsel %vm492_vm14, %v179_v38, %v175_v53  ;;  %v190_v32 = vsel %vm520_vm0, %v276_v8, %v186_v51  ;;  %v217_v62 = vadd.f32 %v208_v59, %v207_v55  ;;  %v222_v63 = vadd.f32 %v210_v60, %v209_v56 }
  0x34   :  { %v195_v57 = vsel %vm192_vm3, %v194_v48, %v190_v32  ;;  %v199_v42 = vmul.f32 %v422_v31, %v180_v45 }
  0x35   :  { %v200_v58 = vmul.f32 %v430_v34, %v195_v57  ;;  %219 = vst [vmem:[#allocation7 + $0x8] sm:$0xff] %v217_v62 }
  0x36   :  { %v201_v17 = vsel %vm197_vm2, %v180_v45, %v199_v42  ;;  %224 = vst [vmem:[#allocation7 + $0x10] sm:$0xff] %v222_v63 }
  0x37   :  { %v202_v61 = vsel %vm198_vm4, %v195_v57, %v200_v58  ;;  %v203_v31 = vmul.f32 %v201_v17, %v201_v17 }
  0x38   :  { %v204_v4 = vmul.f32 %v202_v61, %v202_v61 }
  0x39   :  { %v205_v5 = vmul.f32 %v203_v31, %v149_v25 }
  0x3a   :  { %v206_v6 = vmul.f32 %v204_v4, %v150_v2 }
  0x3c   :  { %v212_v0 = vadd.f32 %v206_v6, %v205_v5 }
  0x3e   :  { %214 = vst [vmem:[#allocation7] sm:$0xff] %v212_v0 }
  0x3f   :  { %237 = dma.vmem_to_hbm [thread:$0]  %s230_s1, 384, %s232_s23, [#allocation4], %s356_s17, %s356_s17, %s357_s18  }
  0x40   :  { %353 = dma.done.wait [#allocation4], 384  }
  0x41   :  { %354 = vsyncadd [#allocation4], 4294966912 }
  0x42   :  { %242 = vsyncpa [#allocation3], 1 }
  0x43   :  { %243 = vsyncpa [#allocation6], 1 }
  0x44   :  { %244 = vsyncpa [#allocation4], 1 }

</bundles_post_ra>
